<compile_context>
chip_gen: v7x
topology: tpu7x:2x2x1
jax: 0.10.0
libtpu: 0.0.40
codegen_flags: <defaults>
</compile_context>

<pallas_src>
import jax
import jax.numpy as jnp
from jax.experimental import pallas as pl
from jax.experimental.pallas import tpu as pltpu


# ----------------------------------------------------------------------------
# Hardware-aware sizing helpers
# ----------------------------------------------------------------------------
def _physical_vmem_bytes() -> int:
    """Best-effort query of per-core VMEM capacity (conservative fallback)."""
    try:
        info = pltpu.get_tpu_info()
        v = getattr(info, "vmem_capacity_bytes", None)
        if v:
            return int(v)
    except Exception:
        pass
    return 64 * 1024 * 1024  # assume the smaller (v7x-like) budget


def _round_up(x: int, m: int) -> int:
    return ((x + m - 1) // m) * m


# ----------------------------------------------------------------------------
# SqueezeExcitation forward
# ----------------------------------------------------------------------------
def squeeze_excitation(x, w1, b1, w2, b2, *,
                       max_fused_slab_bytes=None, _force_thw=None):
    """EfficientNet SE block.

    x : [N, expand_c, H, W]   (NCHW, any float dtype)
    w1: [Sq, C]  b1: [Sq]     (fc1, 1x1 conv weights squeezed)
    w2: [C, Sq]  b2: [C]      (fc2)
    Returns array with x's shape and dtype.
    """
    N, C, H, W = x.shape
    HW = H * W
    Sq = w1.shape[0]
    x_flat = x.reshape(N, C, HW)
    itemsize = x_flat.dtype.itemsize
    inv_hw = 1.0 / float(HW)

    # Weights kept in their natural orientation; biases as columns so every
    # intermediate ([C,1] pooled, [Sq,1] s1, [C,1] scale) shares one layout.
    w1m = jnp.asarray(w1).reshape(Sq, C)
    w2m = jnp.asarray(w2).reshape(C, Sq)
    b1c = jnp.asarray(b1).reshape(Sq, 1).astype(jnp.float32)
    b2c = jnp.asarray(b2).reshape(C, 1).astype(jnp.float32)

    vmem_phys = _physical_vmem_bytes()
    small_vmem = vmem_phys <= 64 * 1024 * 1024          # v7x-like
    if max_fused_slab_bytes is None:
        max_fused_slab_bytes = (10 if small_vmem else 24) * 1024 * 1024

    slab_bytes = C * HW * itemsize
    weight_bytes = (Sq * C + C * Sq + Sq + C) * 4

    # ------------------------------------------------------------------
    # Fast path: fused pool + fc1/SiLU/fc2/sigmoid + rescale, grid=(N,).
    # One HBM read and one HBM write of x; scale stays on-chip.
    # ------------------------------------------------------------------
    if slab_bytes <= max_fused_slab_bytes:

        def _fused_kernel(x_ref, w1_ref, b1_ref, w2_ref, b2_ref, o_ref):
            xt = x_ref[0]                                            # [C, HW]
            # Global average pool: lane reduce, accumulate in f32.
            pooled = jnp.sum(xt, axis=-1, keepdims=True,
                             dtype=jnp.float32) * inv_hw             # [C, 1]
            # fc1 + SiLU  (tiny matmul, f32)
            s1 = jnp.dot(w1_ref[...], pooled,
                         preferred_element_type=jnp.float32) + b1_ref[...]
            s1 = s1 * jax.nn.sigmoid(s1)                             # [Sq, 1]
            # fc2 + sigmoid
            s2 = jnp.dot(w2_ref[...], s1,
                         preferred_element_type=jnp.float32) + b2_ref[...]
            scale = jax.nn.sigmoid(s2)                               # [C, 1]
            # Rescale in f32 (promotion), cast once at the store.
            o_ref[0] = (xt * scale).astype(o_ref.dtype)

        vmem_limit = int(min(4 * slab_bytes + weight_bytes + (4 << 20),
                             (46 << 20) if small_vmem else (100 << 20)))
        vmem_limit = max(vmem_limit, 32 << 20)

        out_flat = pl.pallas_call(
            _fused_kernel,
            out_shape=jax.ShapeDtypeStruct((N, C, HW), x.dtype),
            grid=(N,),
            in_specs=[
                pl.BlockSpec((1, C, HW), lambda n: (n, 0, 0)),   # x slab
                pl.BlockSpec((Sq, C), lambda n: (0, 0)),         # w1 resident
                pl.BlockSpec((Sq, 1), lambda n: (0, 0)),         # b1 resident
                pl.BlockSpec((C, Sq), lambda n: (0, 0)),         # w2 resident
                pl.BlockSpec((C, 1), lambda n: (0, 0)),          # b2 resident
            ],
            out_specs=pl.BlockSpec((1, C, HW), lambda n: (n, 0, 0)),
            compiler_params=pltpu.CompilerParams(
                dimension_semantics=("parallel",),
                vmem_limit_bytes=vmem_limit),
            cost_estimate=pl.CostEstimate(
                flops=int(2 * N * C * HW + 4 * N * C * Sq),
                transcendentals=int(N * (C + Sq)),
                bytes_accessed=int(2 * N * C * HW * itemsize + weight_bytes)),
        )(x_flat, w1m, b1c, w2m, b2c)

        return out_flat.reshape(N, C, H, W)

    # ------------------------------------------------------------------
    # Fallback: streamed two-pass path for very large per-sample slabs.
    # ------------------------------------------------------------------
    # Byte-targeted lane tile (multiple of 128); zero-pad HW to a tile multiple.
    per_row_bytes = C * itemsize
    target_block_bytes = (4 << 20) if small_vmem else (2 << 20)
    if _force_thw is not None:
        thw = int(_force_thw)
    else:
        thw = max(128, (target_block_bytes // per_row_bytes) // 128 * 128)
        # keep 4 double-buffered blocks well under the 32 MiB scoped default
        max_thw = max(128, ((24 << 20) // (4 * per_row_bytes)) // 128 * 128)
        thw = min(thw, max_thw)
    thw = min(thw, _round_up(HW, 128))
    hw_pad = _round_up(HW, thw)
    num_hw = hw_pad // thw
    if hw_pad != HW:
        # Zero padding does not change the pooled sum (we divide by true HW);
        # padded output lanes are sliced off below.
        x_flat = jnp.pad(x_flat, ((0, 0), (0, 0), (0, hw_pad - HW)))

    # ---- Pass 1: streamed global-average-pool + FCs -> per-sample scale ----
    def _pool_fc_kernel(x_ref, w1_ref, b1_ref, w2_ref, b2_ref,
                        scale_ref, acc_ref):
        hw = pl.program_id(1)

        @pl.when(hw == 0)
        def _():
            acc_ref[...] = jnp.zeros_like(acc_ref)

        # Partial spatial sum of the native-dtype tile, accumulated in f32,
        # kept as a [C, 1] column (no sublane<->lane relayout needed later).
        acc_ref[...] += jnp.sum(x_ref[0], axis=-1, keepdims=True,
                                dtype=jnp.float32)

        @pl.when(hw == pl.num_programs(1) - 1)
        def _():
            pooled = acc_ref[...] * inv_hw                           # [C, 1]
            s1 = jnp.dot(w1_ref[...], pooled,
                         preferred_element_type=jnp.float32) + b1_ref[...]
            s1 = s1 * jax.nn.sigmoid(s1)                             # SiLU
            s2 = jnp.dot(w2_ref[...], s1,
                         preferred_element_type=jnp.float32) + b2_ref[...]
            scale_ref[0] = jax.nn.sigmoid(s2)                        # [C, 1]

    scale = pl.pallas_call(
        _pool_fc_kernel,
        out_shape=jax.ShapeDtypeStruct((N, C, 1), jnp.float32),
        grid=(N, num_hw),
        in_specs=[
            pl.BlockSpec((1, C, thw), lambda n, hw: (n, 0, hw)),     # x stream
            pl.BlockSpec((Sq, C), lambda n, hw: (0, 0)),
            pl.BlockSpec((Sq, 1), lambda n, hw: (0, 0)),
            pl.BlockSpec((C, Sq), lambda n, hw: (0, 0)),
            pl.BlockSpec((C, 1), lambda n, hw: (0, 0)),
        ],
        out_specs=pl.BlockSpec((1, C, 1), lambda n, hw: (n, 0, 0)),
        scratch_shapes=[pltpu.VMEM((C, 1), jnp.float32)],
        compiler_params=pltpu.CompilerParams(
            dimension_semantics=("parallel", "arbitrary"),
            vmem_limit_bytes=32 * 1024 * 1024),
        cost_estimate=pl.CostEstimate(
            flops=int(N * C * hw_pad + 4 * N * C * Sq),
            transcendentals=int(N * (C + Sq)),
            bytes_accessed=int(N * C * hw_pad * itemsize
                               + N * C * 4 + weight_bytes)),
    )(x_flat, w1m, b1c, w2m, b2c)

    # ---- Pass 2: streamed rescale ----
    def _rescale_kernel(scale_ref, x_ref, o_ref):
        o_ref[...] = (x_ref[...] * scale_ref[...]).astype(o_ref.dtype)

    out_flat = pl.pallas_call(
        _rescale_kernel,
        out_shape=jax.ShapeDtypeStruct((N, C, hw_pad), x.dtype),
        grid=(N, num_hw),
        in_specs=[
            pl.BlockSpec((1, C, 1), lambda n, hw: (n, 0, 0)),        # scale
            pl.BlockSpec((1, C, thw), lambda n, hw: (n, 0, hw)),     # x stream
        ],
        out_specs=pl.BlockSpec((1, C, thw), lambda n, hw: (n, 0, hw)),
        compiler_params=pltpu.CompilerParams(
            dimension_semantics=("parallel", "parallel"),
            vmem_limit_bytes=32 * 1024 * 1024),
        cost_estimate=pl.CostEstimate(
            flops=int(N * C * hw_pad),
            transcendentals=0,
            bytes_accessed=int(2 * N * C * hw_pad * itemsize + N * C * 4)),
    )(scale, x_flat)

    if hw_pad != HW:
        out_flat = out_flat[:, :, :HW]
    return out_flat.reshape(N, C, H, W)


# ----------------------------------------------------------------------------
# Pure-JAX reference mirroring the PyTorch forward (computed in f32)
# ----------------------------------------------------------------------------
def reference_se(x, w1, b1, w2, b2):
    xf = x.astype(jnp.float32)
    pooled = jnp.mean(xf, axis=(2, 3))                 # [N, C]
    s1 = pooled @ w1.T + b1                            # [N, Sq]
    s1 = s1 * jax.nn.sigmoid(s1)                       # SiLU
    s2 = s1 @ w2.T + b2                                # [N, C]
    scale = jax.nn.sigmoid(s2)                         # [N, C]
    return scale[:, :, None, None] * xf


def _make_params(key, expand_c, squeeze_c):
    k1, k2, k3, k4 = jax.random.split(key, 4)
    w1 = jax.random.normal(k1, (squeeze_c, expand_c), dtype=jnp.float32) * 0.1
    b1 = jax.random.normal(k2, (squeeze_c,), dtype=jnp.float32) * 0.1
    w2 = jax.random.normal(k3, (expand_c, squeeze_c), dtype=jnp.float32) * 0.1
    b2 = jax.random.normal(k4, (expand_c,), dtype=jnp.float32) * 0.1
    return w1, b1, w2, b2


if __name__ == "__main__":
    key = jax.random.PRNGKey(0)
    k_main, k_bf16, k_fb = jax.random.split(key, 3)

    # --- Case 1 (fused path): input_c=4, expand_c=4, squeeze_factor=4 (Sq=1),
    #     f32, N=2, H=W=16. ---
    input_c, expand_c = 4, 4
    squeeze_c = input_c // 4
    N, H, W = 2, 16, 16
    kx, kp = jax.random.split(k_main, 2)
    x = jax.random.normal(kx, (N, expand_c, H, W), dtype=jnp.float32)
    w1, b1, w2, b2 = _make_params(kp, expand_c, squeeze_c)

    out = jax.block_until_ready(squeeze_excitation(x, w1, b1, w2, b2))
    ref = reference_se(x, w1, b1, w2, b2)
    assert out.shape == x.shape and out.dtype == x.dtype
    assert jnp.allclose(out, ref, atol=1e-5, rtol=1e-5), "f32 fused mismatch"

    # --- Case 2 (fused path): bf16, small spatial stage 7x7 (HW=49, not a
    #     multiple of 128), expand_c=16, Sq=2. ---
    input_c2, expand_c2 = 8, 16
    squeeze_c2 = input_c2 // 4
    N2, H2, W2 = 2, 7, 7
    kx2, kp2 = jax.random.split(k_bf16, 2)
    x2 = jax.random.normal(kx2, (N2, expand_c2, H2, W2), dtype=jnp.bfloat16)
    w1b, b1b, w2b, b2b = _make_params(kp2, expand_c2, squeeze_c2)

    out2 = jax.block_until_ready(squeeze_excitation(x2, w1b, b1b, w2b, b2b))
    ref2 = reference_se(x2, w1b, b1b, w2b, b2b)
    assert out2.shape == x2.shape and out2.dtype == x2.dtype
    assert jnp.allclose(out2.astype(jnp.float32), ref2, atol=5e-2, rtol=5e-2), \
        "bf16 fused mismatch"

    # --- Case 3 (forced streamed fallback, multi-block HW accumulation):
    #     f32, expand_c=8, H=W=32 (HW=1024), thw forced to 256 -> 4 HW blocks.
    expand_c3, squeeze_c3 = 8, 2
    N3, H3, W3 = 2, 32, 32
    kx3, kp3 = jax.random.split(k_fb, 2)
    x3 = jax.random.normal(kx3, (N3, expand_c3, H3, W3), dtype=jnp.float32)
    w1c, b1c_, w2c, b2c_ = _make_params(kp3, expand_c3, squeeze_c3)

    out3 = jax.block_until_ready(
        squeeze_excitation(x3, w1c, b1c_, w2c, b2c_,
                           max_fused_slab_bytes=0, _force_thw=256))
    ref3 = reference_se(x3, w1c, b1c_, w2c, b2c_)
    assert out3.shape == x3.shape and out3.dtype == x3.dtype
    assert jnp.allclose(out3, ref3, atol=1e-5, rtol=1e-5), \
        "f32 streamed-fallback mismatch"

    # --- Case 4 (forced streamed fallback with HW zero-padding, HW=49 -> 128).
    out4 = jax.block_until_ready(
        squeeze_excitation(x2, w1b, b1b, w2b, b2b, max_fused_slab_bytes=0))
    assert out4.shape == x2.shape and out4.dtype == x2.dtype
    assert jnp.allclose(out4.astype(jnp.float32), ref2, atol=5e-2, rtol=5e-2), \
        "bf16 padded-fallback mismatch"

    print("KERNEL_OK")
</pallas_src>

<mosaic_0001>
module attributes {stable_mosaic.version = 11 : i64} {
  func.func @_fused_kernel(%arg0: i32, %arg1: memref<1x4x256xf32, #tpu.memory_space<vmem>>, %arg2: memref<1x4xf32, #tpu.memory_space<vmem>>, %arg3: memref<1x1xf32, #tpu.memory_space<vmem>>, %arg4: memref<4x1xf32, #tpu.memory_space<vmem>>, %arg5: memref<4x1xf32, #tpu.memory_space<vmem>>, %arg6: memref<1x4x256xf32, #tpu.memory_space<vmem>>) attributes {dimension_semantics = [#tpu.dimension_semantics<parallel>], iteration_bounds = array<i64: 2>, scalar_prefetch = 0 : i64, scratch_operands = 0 : i64, tpu.core_type = #tpu.core_type<tc>, window_params = [{transform_indices = @transform_0, window_bounds = array<i64: 1, 4, 256>}, {pipeline_mode = #tpu.pipeline_mode<synchronous>, transform_indices = @transform_1, window_bounds = array<i64: 1, 4>}, {pipeline_mode = #tpu.pipeline_mode<synchronous>, transform_indices = @transform_2, window_bounds = array<i64: 1, 1>}, {pipeline_mode = #tpu.pipeline_mode<synchronous>, transform_indices = @transform_3, window_bounds = array<i64: 4, 1>}, {pipeline_mode = #tpu.pipeline_mode<synchronous>, transform_indices = @transform_4, window_bounds = array<i64: 4, 1>}, {transform_indices = @transform_5, window_bounds = array<i64: 1, 4, 256>}]} {
    %c0 = arith.constant 0 : index
    %c0_0 = arith.constant 0 : index
    %c0_1 = arith.constant 0 : index
    %0 = vector.load %arg1[%c0, %c0_0, %c0_1] : memref<1x4x256xf32, #tpu.memory_space<vmem>>, vector<1x4x256xf32>
    %1 = vector.shape_cast %0 : vector<1x4x256xf32> to vector<4x256xf32>
    %cst = arith.constant dense<0.000000e+00> : vector<4xf32>
    %2 = vector.multi_reduction <add>, %1, %cst [1] : vector<4x256xf32> to vector<4xf32>
    %3 = vector.shape_cast %2 : vector<4xf32> to vector<4x1xf32>
    %cst_2 = arith.constant 3.906250e-03 : f32
    %4 = vector.broadcast %cst_2 : f32 to vector<4x1xf32>
    %5 = arith.mulf %3, %4 : vector<4x1xf32>
    %c0_3 = arith.constant 0 : index
    %c0_4 = arith.constant 0 : index
    %6 = vector.load %arg2[%c0_3, %c0_4] : memref<1x4xf32, #tpu.memory_space<vmem>>, vector<1x4xf32>
    %cst_5 = arith.constant dense<0.000000e+00> : vector<1x1xf32>
    %7 = tpu.matmul %6, %5, %cst_5 {dimension_numbers = #tpu.dot_dimension_numbers<[1], [0], [0], [1], [0, 0, 1, 1], [], []>} : vector<1x4xf32>, vector<4x1xf32>, vector<1x1xf32> -> vector<1x1xf32>
    %c0_6 = arith.constant 0 : index
    %c0_7 = arith.constant 0 : index
    %8 = vector.load %arg3[%c0_6, %c0_7] : memref<1x1xf32, #tpu.memory_space<vmem>>, vector<1x1xf32>
    %9 = arith.addf %7, %8 : vector<1x1xf32>
    %10 = arith.negf %9 : vector<1x1xf32>
    %11 = math.exp %10 : vector<1x1xf32>
    %cst_8 = arith.constant 1.000000e+00 : f32
    %12 = vector.broadcast %cst_8 : f32 to vector<1x1xf32>
    %13 = arith.addf %12, %11 : vector<1x1xf32>
    %14 = arith.divf %12, %13 : vector<1x1xf32>
    %15 = arith.mulf %9, %14 : vector<1x1xf32>
    %c0_9 = arith.constant 0 : index
    %c0_10 = arith.constant 0 : index
    %16 = vector.load %arg4[%c0_9, %c0_10] : memref<4x1xf32, #tpu.memory_space<vmem>>, vector<4x1xf32>
    %cst_11 = arith.constant dense<0.000000e+00> : vector<4x1xf32>
    %17 = tpu.matmul %16, %15, %cst_11 {dimension_numbers = #tpu.dot_dimension_numbers<[1], [0], [0], [1], [0, 0, 1, 1], [], []>} : vector<4x1xf32>, vector<1x1xf32>, vector<4x1xf32> -> vector<4x1xf32>
    %c0_12 = arith.constant 0 : index
    %c0_13 = arith.constant 0 : index
    %18 = vector.load %arg5[%c0_12, %c0_13] : memref<4x1xf32, #tpu.memory_space<vmem>>, vector<4x1xf32>
    %19 = arith.addf %17, %18 : vector<4x1xf32>
    %20 = arith.negf %19 : vector<4x1xf32>
    %21 = math.exp %20 : vector<4x1xf32>
    %cst_14 = arith.constant 1.000000e+00 : f32
    %22 = vector.broadcast %cst_14 : f32 to vector<4x1xf32>
    %23 = arith.addf %22, %21 : vector<4x1xf32>
    %24 = arith.divf %22, %23 : vector<4x1xf32>
    %25 = vector.broadcast %24 : vector<4x1xf32> to vector<4x256xf32>
    %26 = arith.mulf %1, %25 : vector<4x256xf32>
    %c0_15 = arith.constant 0 : index
    %c0_16 = arith.constant 0 : index
    %c0_17 = arith.constant 0 : index
    %27 = vector.load %arg6[%c0_15, %c0_16, %c0_17] : memref<1x4x256xf32, #tpu.memory_space<vmem>>, vector<1x4x256xf32>
    %28 = vector.shape_cast %27 : vector<1x4x256xf32> to vector<4x256xf32>
    %29 = vector.shape_cast %26 : vector<4x256xf32> to vector<1x4x256xf32>
    tpu.vector_store %arg6[%c0_15, %c0_16, %c0_17], %29 {strides = array<i32>} : memref<1x4x256xf32, #tpu.memory_space<vmem>>, vector<1x4x256xf32>,
    return
  }
  func.func @transform_0(%arg0: i32) -> (i32, i32, i32) {
    %c0_i32 = arith.constant 0 : i32
    %c0_i32_0 = arith.constant 0 : i32
    %c0_i32_1 = arith.constant 0 : i32
    return %arg0, %c0_i32, %c0_i32_0 : i32, i32, i32
  }
  func.func @transform_1(%arg0: i32) -> (i32, i32) {
    %c0_i32 = arith.constant 0 : i32
    %c0_i32_0 = arith.constant 0 : i32
    %c0_i32_1 = arith.constant 0 : i32
    return %c0_i32, %c0_i32_0 : i32, i32
  }
  func.func @transform_2(%arg0: i32) -> (i32, i32) {
    %c0_i32 = arith.constant 0 : i32
    %c0_i32_0 = arith.constant 0 : i32
    %c0_i32_1 = arith.constant 0 : i32
    return %c0_i32, %c0_i32_0 : i32, i32
  }
  func.func @transform_3(%arg0: i32) -> (i32, i32) {
    %c0_i32 = arith.constant 0 : i32
    %c0_i32_0 = arith.constant 0 : i32
    %c0_i32_1 = arith.constant 0 : i32
    return %c0_i32, %c0_i32_0 : i32, i32
  }
  func.func @transform_4(%arg0: i32) -> (i32, i32) {
    %c0_i32 = arith.constant 0 : i32
    %c0_i32_0 = arith.constant 0 : i32
    %c0_i32_1 = arith.constant 0 : i32
    return %c0_i32, %c0_i32_0 : i32, i32
  }
  func.func @transform_5(%arg0: i32) -> (i32, i32, i32) {
    %c0_i32 = arith.constant 0 : i32
    %c0_i32_0 = arith.constant 0 : i32
    %c0_i32_1 = arith.constant 0 : i32
    return %arg0, %c0_i32, %c0_i32_0 : i32, i32, i32
  }
}

</mosaic_0001>

<bundles_post_ra>
// kernel: tpu_custom_call.1
= control target key start
LH: loop header
LB: loop body
LE: loop exit
PB: predicated region body
PF: predicated region fallthrough
CT: control target
= control target key end

     0   :  { %s935_s0 = inlined_call_operand.hbm [shape: f32[2,4,256], index: 0, kind: input, shape index: {}]   ;;  %s936_s1 = inlined_call_operand.vmem [shape: f32[1,4], index: 1, kind: input, shape index: {}]   ;;  %s937_s2 = inlined_call_operand.<no memory space> [shape: f32[1,1], index: 2, kind: input, shape index: {}]   ;;  %s938_s3 = inlined_call_operand.vmem [shape: f32[4,1], index: 3, kind: input, shape index: {}]   ;;  %s939_s4 = inlined_call_operand.vmem [shape: f32[4,1], index: 4, kind: input, shape index: {}]   ;;  %s940_s5 = inlined_call_operand.hbm [shape: f32[2,4,256], index: 5, kind: output, shape index: {}]  }
   0x1   :  { %v10_v0 = vstv %s937_s2 }
   0x2   :  { %11 = vst [vmem:[#allocation2] sm:$0x1] %v10_v0 }
   0x3   :  { %12 = vsyncpa [#allocation4], 0 }
   0x4   :  { %14 = vsyncpa [#allocation4 + $0x1], 0 }
   0x5   :  { %15 = vsyncpa [#allocation5], 0 }
   0x6   :  { %17 = vsyncpa [#allocation5 + $0x1], 0  ;;  %s758_s20 = smov 0   ;;  %s760_s21 = smov 0  }
   0x7   :  { %s762_s22 = smov 0   ;;  %s764_s23 = smov 0  }
   0x8 LB: > { %s779_s2 = sadd.s32 4294967295, %s717_s23   ;;  %s525_s24 = sadd.s32 4294967294, %s717_s23   ;;  %s717_s23 = sphi %s764_s23, %s955_s23   ;;  %s713_s22 = sphi %s762_s22, %s954_s22   ;;  %s709_s21 = sphi %s760_s21, %s953_s21   ;;  %s705_s20 = sphi %s758_s20, %s952_s20  }
   0x9   : > { %s783_s25 = sadd.s32 1, %s717_s23   ;;  %s30_s26 = sadd.s32 1, %s713_s22 }
   0xa   : > { %s27_s27 = ssub.s32 %s717_s23, %s783_s25  ;;  %p37_p0 = scmp.ne.s32.totalorder %s713_s22, %s709_s21 }
   0xb   : > { %p28_p1 = scmp.eq.s32.totalorder %s27_s27, 0  ;;  %p38_p2 = scmp.eq.s32.totalorder %s717_s23, 0 }
   0xc   : > { %p43_p3 = scmp.ne.s32.totalorder %s709_s21, %s705_s20  ;;  %p44_p4 = scmp.eq.s32.totalorder %s779_s2, 0 }
   0xd   : > { %s795_s28 = scalar_select %p28_p1, %s713_s22, %s30_s26  }
   0xe   : > { %p797_p5 = por %p38_p2, %p37_p0  ;;  %p801_p6 = por %p44_p4, %p43_p3 }
   0xf   : > { %p151_p7 = scmp.eq.s32.totalorder %s779_s2, 1  ;;  %p157_p8 = scmp.eq.s32.totalorder %s525_s24, 1 }
  0x10   : > { %p573_p10 = scmp.lt.s32.totalorder %s717_s23, 2  ;;  %s189_s8 = sand.u32 1, %s713_s22  }
  0x11   : > { %p808_p11 = por %p151_p7, %p37_p0  ;;  %p812_p12 = por %p157_p8, %p43_p3 }
  0x12   : > { %s545_s9 = sshll.u32 %s717_s23, 7  ;;  %s528_s10 = sshll.u32 %s189_s8, 3 }
  0x13   : > { %s944_s6 = scalar_select %p808_p11, 1, 0 }
  0x14   : > { %s945_s7 = scalar_select %p812_p12, 1, 0 }
  0x15   : > { %s821_s13 = scalar_lea.hbm %s935_s0, %s545_s9  ;;  %s193_s14 = scalar_lea.vmem [#allocation3], %s528_s10 }
  0x16   : > { %s201_s15 = sshll.u32 %s193_s14, 4  ;;  %p825_p13 = pnand %p573_p10, %p797_p5  ;;  %s829_s15 = int_to_ptr.vmem [resolvable:$true] %s201_s15 }
  0x17   : > { %s190_s17 = scalar_lea.sflag [#allocation4], %s189_s8  ;;  %s621_s18 = scalar_lea.hbm %s821_s13, 128 }
  0x18   : > { %p622_p2 = scmp.ne.s32.totalorder %s821_s13, %s621_s18  ;;  %p623_p3 = pneg %p825_p13 }
  0x19   : > { %s626_s26 = scalar_lea.hbm %s935_s0, 256  ;;  %p627_p5 = scmp.lt.u32.totalorder %s821_s13, %s935_s0 }
  0x1a   : > { %p624_p4 = pnand %p623_p3, %p622_p2  ;;  %p628_p8 = scmp.lt.u32.totalorder %s626_s26, %s621_s18 }
  0x1b   : > { %p630_p9 = scmp.lt.u32.totalorder %s621_s18, %s821_s13 }
  0x1c   : > { %p625_p7 = pneg %p624_p4  ;;  %p629_p10 = por %p628_p8, %p627_p5 }
  0x1e   : > { %p631_p0 = por %p630_p9, %p629_p10 }
  0x20   : > { %p632_p1 = pnand %p631_p0, %p625_p7 }
  0x22   : > { %635 = shalt.err (!%p632_p1)
}
  0x23   : > { %s636_s8 = scalar_lea.vmem %s829_s15, 128  ;;  %s719_s9 = smov [#allocation3]  }
  0x24   : > { %p637_p2 = scmp.ne.s32.totalorder %s829_s15, %s636_s8  ;;  %s641_s10 = sshll.u32 %s719_s9, 4  ;;  %s642_s10 = int_to_ptr.vmem [resolvable:$false] %s641_s10 }
  0x25   : > { %s643_s11 = scalar_lea.vmem %s642_s10, 256  ;;  %p644_p11 = scmp.lt.s32.totalorder %s829_s15, %s642_s10 }
  0x26   : > { %p639_p4 = pnand %p637_p2, %p623_p3  ;;  %p645_p5 = scmp.lt.s32.totalorder %s643_s11, %s636_s8 }
  0x28   : > { %p640_p12 = pneg %p639_p4  ;;  %p646_p8 = por %p645_p5, %p644_p11 }
  0x2a   : > { %p647_p9 = pnand %p646_p8, %p640_p12 }
  0x2c   : > { %650 = shalt.err (!%p647_p9)
}
  0x2d   : > { %568 = dma.hbm_to_vmem [thread:$0]  (!%p825_p13), %s821_s13, 128, %s829_s15, %s190_s17  }
  0x2e   : > { %p947_p0 = scmp.lt.s32.totalorder %s717_s23, 3  ;;  %p948_p1 = scmp.ge.s32.totalorder %s717_s23, 1 }
  0x30   : > { %p207_p3 = pnand %p948_p1, %p947_p0 }
  0x31   : > { %s863_s12 = sand.u32 (!%p207_p3), 1, %s709_s21  }
  0x32   : > { %210 = sbr.rel (%p207_p3) target bundleno = 838 (0x346), region = 40  ;;  %s532_s14 = sshll.u32 (!%p207_p3), %s863_s12, 3 }
  0x33   : > { %s213_s18 = scalar_lea.sflag (!%p207_p3), [#allocation4], %s863_s12  ;;  %s216_s16 = scalar_lea.vmem (!%p207_p3), [#allocation3], %s532_s14 }
  0x39   : > { %696 = dma.done.wait (%p801_p6), %s213_s18, 128  }
  0x3a   : > { %698 = vsyncadd (%p801_p6), %s213_s18, 4294967168  ;;  %vm247_vm0 = vcmask 1043456   ;;  %v243_v1 = vld [vmem:[%s216_s16] sm:$0xff]  ;;  %v720_v6 = vmov 0.0   ;;  %vm721_vm1 = vmmov 0   ;;  %vm256_vm2 = vcmask 31744  }
  0x3b   : > { %v245_v2 = vcombine.high %v243_v1, %v243_v1  ;;  %v248_v3 = vsel %vm247_vm0, %v243_v1, 0.0  ;;  %551 = vmatprep.subr.mxu0 %v720_v6  ;;  %556 = vmatprep.subr.mxu1 %v720_v6  ;;  %v254_v9 = vld [vmem:[%s936_s1] sm:$0x1]  ;;  %vm346_vm3 = vcmask 1040384   ;;  %vm342_vm4 = vcmask 7168   ;;  %s546_s26 = sshll.u32 %s779_s2, 7 }
  0x3c   : > { %553 = vmatprep.mubr.msk.f32.mxu0 %vm721_vm1, %v720_v6  ;;  %558 = vmatprep.mubr.msk.f32.mxu1 %vm721_vm1, %v720_v6  ;;  %v255_v10 = vld [vmem:[#allocation2] sm:$0x1]  ;;  %v722_v20 = vmov 0   ;;  %v723_v29 = vmov 839922192   ;;  %v433_v31 = vlaneseq  ;;  %s242_s27 = scalar_lea.vmem [#allocation6], %s532_s14  ;;  %s891_s10 = scalar_lea.hbm %s940_s5, %s546_s26 }
  0x3d   : > { %v249_v4 = vsel %vm247_vm0, %v245_v2, 0.0  ;;  %v340_v19 = vld [vmem:[%s938_s3] sm:$0xf]  ;;  %611 = vset.pattern.permute.xlu0 %v722_v20  ;;  %v431_v30 = vunpack.c.l.s4 %v723_v29  ;;  %s455_s29 = sshll.u32 %s242_s27, 4  ;;  %s441_s11 = scalar_lea.sflag [#allocation5], %s863_s12  ;;  %s893_s29 = int_to_ptr.vmem [resolvable:$true] %s455_s29 }
  0x3e   : > { %v250_v5 = vadd.f32 %v249_v4, %v248_v3  ;;  %v341_v21 = vld [vmem:[%s939_s4] sm:$0xf]  ;;  %v434_v33 = vshrl.u32 %v433_v31, 7  ;;  %s651_s18 = scalar_lea.vmem %s893_s29, 128  ;;  %p949_p11 = scmp.ne.s32.totalorder %s944_s6, 0 }
  0x3f   : > { %v432_v32 = vunpack.c.0.s8 %v431_v30  ;;  %p652_p6 = scmp.ne.s32.totalorder %s893_s29, %s651_s18  ;;  %s724_s2 = smov [#allocation6]  }
  0x40   : > { %251 = vadd.xlane.f32.xlu0 %v250_v5  ;;  %s655_s14 = sshll.u32 %s724_s2, 4  ;;  %s656_s14 = int_to_ptr.vmem [resolvable:$false] %s655_s14 }
  0x41   : > { %v435_v34 = vsub.s32 %v432_v32, %v434_v33  ;;  %p653_p12 = pnand %p652_p6, %p949_p11  ;;  %s657_s16 = scalar_lea.vmem %s656_s14, 256 }
  0x42   : > { %p658_p7 = scmp.lt.s32.totalorder %s893_s29, %s656_s14  ;;  %p659_p10 = scmp.lt.s32.totalorder %s657_s16, %s651_s18 }
  0x43   : > { %p654_p13 = pneg %p653_p12 }
  0x44   : > { %p660_p2 = por %p659_p10, %p658_p7 }
  0x46   : > { %p661_p4 = pnand %p660_p2, %p654_p13 }
  0xcd   : > { %v252_v7 = vpop.xlane.xlu0 %251 }
  0xce   : > { %v253_v8 = vmul.f32 0.00390625, %v252_v7 }
  0xd0   : > { %552 = vmatpush3.msk.msra.mxu0 %vm247_vm0, %v253_v8 }
  0xd1   : > { %554 = vmatmul.mubr.msk.f32.vlgmr.msra.gmra.mrb[0].mxu0 %vm256_vm2, %v254_v9 }
 0x1a4   : > { %v329_v11 = vpop.f32.mrb[0].mxu0 }
 0x1a5   : > { %v330_v12 = vadd.f32 %v329_v11, %v255_v10  ;;  %v555_v13 = vpop.f32.mrb[1].mxu0 }
 0x1a7   : > { %v536_v14 = vmul.f32 -1.442695, %v330_v12 }
 0x1a9   : > { %613 = vpow2.f32 %v536_v14 }
 0x1b3   : > { %v614_v15 = vpop.eup %613 }
 0x1b4   : > { %v336_v16 = vadd.f32 1.0, %v614_v15 }
 0x1b6   : > { %615 = vrcp.f32 %v336_v16 }
 0x1c0   : > { %v616_v17 = vpop.eup %615 }
 0x1c1   : > { %v339_v18 = vmul.f32 %v616_v17, %v330_v12 }
 0x1c3   : > { %557 = vmatpush3.msk.msra.mxu1 %vm346_vm3, %v339_v18 }
 0x1c4   : > { %559 = vmatmul.mubr.msk.f32.vlgmr.msra.gmra.mrb[0].mxu1 %vm342_vm4, %v340_v19 }
 0x297   : > { %v416_v22 = vpop.f32.mrb[0].mxu1 }
 0x298   : > { %v417_v23 = vadd.f32 %v416_v22, %v341_v21  ;;  %v560_v24 = vpop.f32.mrb[1].mxu1 }
 0x29a   : > { %v539_v25 = vmul.f32 -1.442695, %v417_v23 }
 0x29c   : > { %617 = vpow2.f32 %v539_v25 }
 0x2a6   : > { %v618_v26 = vpop.eup %617 }
 0x2a7   : > { %v423_v27 = vadd.f32 1.0, %v618_v26 }
 0x2a9   : > { %619 = vrcp.f32 %v423_v27 }
 0x2b3   : > { %v620_v28 = vpop.eup %619 }
 0x2b4   : > { %428 = vperm.xlu0 %611, %v620_v28  }
 0x333   : > { %v429_v35 = vpop.permute.xlu0 %428 }
 0x334   : > { %v436_v36 = vrot.slane %v429_v35, %v435_v34 }
 0x336   : > { %v438_v37 = vmul.f32 %v436_v36, %v243_v1 }
 0x338   : > { %439 = vst [vmem:[%s242_s27] sm:$0xff] %v438_v37 }
 0x339   : > { %664 = shalt.err (!%p661_p4)
}
 0x33a   : > { %s665_s12 = scalar_lea.hbm %s891_s10, 128  ;;  %s669_s15 = scalar_lea.hbm %s940_s5, 256 }
 0x33b   : > { %p666_p5 = scmp.ne.s32.totalorder %s891_s10, %s665_s12  ;;  %p670_p0 = scmp.lt.u32.totalorder %s891_s10, %s940_s5 }
 0x33c   : > { %p671_p1 = scmp.lt.u32.totalorder %s669_s15, %s665_s12  ;;  %p673_p6 = scmp.lt.u32.totalorder %s665_s12, %s891_s10 }
 0x33d   : > { %p667_p8 = pnand %p666_p5, %p949_p11 }
 0x33e   : > { %p672_p3 = por %p671_p1, %p670_p0 }
 0x33f   : > { %p668_p9 = pneg %p667_p8 }
 0x340   : > { %p674_p12 = por %p673_p6, %p672_p3 }
 0x342   : > { %p675_p13 = pnand %p674_p12, %p668_p9 }
 0x344   : > { %678 = shalt.err (!%p675_p13)
}
 0x345   : > { %563 = dma.vmem_to_hbm [thread:$0]  (%p949_p11), %s893_s29, 128, %s891_s10, %s441_s11  }
 0x346 PF: > { %s467_s24 = sand.u32 1, %s705_s20   ;;  %p950_p7 = scmp.ne.s32.totalorder %s945_s7, 0 }
 0x347   : > { %p951_p10 = scmp.ge.s32.totalorder %s717_s23, 2  ;;  %s468_s26 = scalar_lea.sflag [#allocation5], %s467_s24 }
 0x349   : > { %p570_p2 = pnand %p951_p10, %p950_p7 }
 0x34b   : > { %700 = dma.done.wait (!%p570_p2), %s468_s26, 128  }
 0x34c   : > { %702 = vsyncadd (!%p570_p2), %s468_s26, 4294967168  ;;  %p20_p4 = scmp.ge.s32.totalorder %s783_s25, 4   ;;  %s952_s20 = smov %s709_s21 }
 0x34d   : > { %s953_s21 = smov %s713_s22  ;;  %s954_s22 = smov %s795_s28 }
 0x34e   : > { %s955_s23 = smov %s783_s25  ;;  %22 = sbr.rel (!%p20_p4) target bundleno = 8 (0x8), region = 85 }
 0x355   :  { %473 = vsyncpa [#allocation4], 1 }
 0x356   :  { %475 = vsyncpa [#allocation4 + $0x1], 1 }
 0x357   :  { %476 = vsyncpa [#allocation5], 1 }
 0x358   :  { %478 = vsyncpa [#allocation5 + $0x1], 1 }

</bundles_post_ra>
